<compile_context>
chip_gen: v5e
topology: v5e:2x2
jax: 0.10.0
libtpu: 0.0.40
codegen_flags: <defaults>
</compile_context>

<pallas_src>
import functools

import jax
import jax.numpy as jnp
from jax import lax
from jax.experimental import pallas as pl
from jax.experimental.pallas import tpu as pltpu


def _loss_kernel(A_ref, A_sq_ref, y_ref, x_ref, out_ref, acc_ref, *,
                 penalty, n_valid, tile, tiles_per_core):
    c = pl.program_id(0)
    t = pl.program_id(1)

    A = A_ref[...]            # (K, D)  resident, matmul dtype
    A_sq = A_sq_ref[...]      # (1, K)  hoisted ||A_k||^2 (f32)
    y = y_ref[...]            # (TN, D) f32
    x = x_ref[...]            # (TN, K) f32

    # Single MXU matmul; f32 accumulation regardless of operand dtype.
    recon = jnp.dot(x.astype(A.dtype), A,
                    preferred_element_type=jnp.float32)               # (TN, D)

    # a_i = 0.5 * ||y_i - x_i A||^2 (direct residual: numerically robust).
    resid = y - recon
    a_rows = 0.5 * jnp.sum(resid * resid, axis=1, keepdims=True)      # (TN, 1)

    # S_i = sum_k x_ik (y_i . A_k) == y_i . recon_i  (reuses the matmul).
    y_sq = jnp.sum(y * y, axis=1, keepdims=True)                      # (TN, 1)
    sy = jnp.sum(y * recon, axis=1, keepdims=True)                    # (TN, 1)
    x_rowsum = jnp.sum(x, axis=1, keepdims=True)                      # (TN, 1)
    xA_sq = jnp.sum(x * A_sq, axis=1, keepdims=True)                  # (TN, 1)
    # b_i = sum_k (||y_i||^2 + ||A_k||^2 - 2 y_i.A_k) x_ik
    b_rows = y_sq * x_rowsum + xA_sq - 2.0 * sy

    c_rows = a_rows + penalty * b_rows                                # (TN, 1)

    # Mask rows that fall outside the (unpadded) batch -- replaces jnp.pad.
    row0 = (c * tiles_per_core + t) * tile
    row_ids = row0 + lax.broadcasted_iota(jnp.int32, c_rows.shape, 0)
    c_rows = jnp.where(row_ids < n_valid, c_rows, 0.0)

    @pl.when(t == 0)
    def _():
        acc_ref[...] = c_rows

    @pl.when(t != 0)
    def _():
        acc_ref[...] += c_rows

    @pl.when(t == pl.num_programs(1) - 1)
    def _():
        # Single cross-lane reduce per core chunk, only in the epilogue.
        out_ref[...] = jnp.sum(acc_ref[...]).reshape(1, 1, 1)


def _round_up(v, m):
    return (v + m - 1) // m * m


def _cdiv(a, b):
    return (a + b - 1) // b


def local_dictionary_loss(A, y, x, penalty, *, tile_n=512, num_core_splits=1,
                          matmul_dtype=None):
    """Pallas implementation of LocalDictionaryLoss.forward(A, y, x)."""
    N, D = y.shape
    K, D2 = A.shape
    assert D == D2 and x.shape == (N, K)

    A = A.astype(jnp.float32)
    y = y.astype(jnp.float32)
    x = x.astype(jnp.float32)

    mm_dtype = jnp.float32 if matmul_dtype is None else jnp.dtype(matmul_dtype)

    # Hoisted A-only quantities, computed once in f32 before any cast.
    A_sq = jnp.sum(A * A, axis=1, keepdims=True).T                    # (1, K)
    A_mm = A.astype(mm_dtype)

    # Row tile: multiple of 8, shrunk so double-buffered y/x tiles plus the
    # (double-buffered) resident A fit comfortably inside scoped VMEM.
    tile = max(8, min(int(tile_n), _round_up(N, 8)))
    tile = _round_up(tile, 8)
    a_bytes = 2 * (K * D * jnp.dtype(mm_dtype).itemsize + K * 4)
    budget = 40 << 20
    while tile > 8 and 2 * tile * (D + K) * 4 + a_bytes > budget:
        tile = max(8, _round_up(tile // 2, 8))
    # TODO(synk): if the resident A alone (2*K*D) blows the VMEM budget, A
    # itself needs K/D tiling; not implemented here.

    n_row_blocks = _cdiv(N, tile)
    num_core_splits = max(1, min(int(num_core_splits), n_row_blocks))
    tiles_per_core = _cdiv(n_row_blocks, num_core_splits)
    last_block = n_row_blocks - 1

    def row_map(c, t):
        # Clamp fully out-of-range blocks (their rows are masked to zero in
        # the kernel), so no DMA ever targets a block index past the array.
        return (jnp.minimum(c * tiles_per_core + t, last_block), 0)

    kernel = functools.partial(
        _loss_kernel, penalty=float(penalty), n_valid=int(N),
        tile=int(tile), tiles_per_core=int(tiles_per_core))

    if num_core_splits > 1:
        # Real 2-TC sharding on v7x; harmless fallback elsewhere.
        outer_sem = getattr(pltpu, "CORE_PARALLEL", "parallel")
        inner_sem = getattr(pltpu, "ARBITRARY", "arbitrary")
        dim_sem = (outer_sem, inner_sem)
    else:
        dim_sem = ("arbitrary", "arbitrary")

    vmem_limit = int(min(max(2 * (2 * tile * (D + K) * 4 + a_bytes), 32 << 20),
                         56 << 20))

    # TODO(synk): for ragged K/D, a one-time lane repack to multiples of 128
    # would improve MXU utilization at the cost of an HBM copy of x/y.

    partials = pl.pallas_call(
        kernel,
        out_shape=jax.ShapeDtypeStruct((num_core_splits, 1, 1), jnp.float32),
        grid_spec=pltpu.PrefetchScalarGridSpec(
            num_scalar_prefetch=0,
            grid=(num_core_splits, tiles_per_core),
            in_specs=[
                pl.BlockSpec((K, D), lambda c, t: (0, 0)),     # A, resident
                pl.BlockSpec((1, K), lambda c, t: (0, 0)),     # ||A_k||^2, resident
                pl.BlockSpec((tile, D), row_map),              # y tile
                pl.BlockSpec((tile, K), row_map),              # x tile
            ],
            out_specs=pl.BlockSpec((1, 1, 1), lambda c, t: (c, 0, 0)),
            scratch_shapes=[pltpu.VMEM((tile, 1), jnp.float32)],
        ),
        compiler_params=pltpu.CompilerParams(
            dimension_semantics=dim_sem,
            vmem_limit_bytes=vmem_limit,
        ),
    )(A_mm, A_sq, y, x)

    # Final combine (per-core partials already include the penalty term).
    return jnp.sum(partials) / N


def _reference_loss(A, y, x, penalty):
    # pure-JAX reference mirroring the PyTorch forward_detailed
    weight = jnp.sum((y[:, None, :] - A[None, :, :]) ** 2, axis=2)
    a = 0.5 * jnp.mean(jnp.sum((y - x @ A) ** 2, axis=1))
    b = jnp.mean(jnp.sum(weight * x, axis=1))
    return a + b * penalty


if __name__ == "__main__":
    key = jax.random.PRNGKey(0)
    kA, ky, kx = jax.random.split(key, 3)

    K, D = 16, 32
    penalty = 0.5

    A = jax.random.normal(kA, (K, D), dtype=jnp.float32)

    # N=16 hits the clean-tile path; N=19 exercises the in-kernel ragged-tail
    # masking (no wrapper-side padding of y/x anymore).
    for N in (16, 19):
        ky_n, kx_n = jax.random.split(jax.random.fold_in(ky, N))
        y = jax.random.normal(ky_n, (N, D), dtype=jnp.float32)
        # codes: nonnegative, row-normalized (simplex-like, as in k-deep-simplex)
        x = jax.nn.softmax(jax.random.normal(kx_n, (N, K), dtype=jnp.float32),
                           axis=-1)

        loss = jax.block_until_ready(local_dictionary_loss(A, y, x, penalty))
        ref = _reference_loss(A, y, x, penalty)
        assert jnp.allclose(loss, ref, rtol=1e-4, atol=1e-3), (N, loss, ref)

    print("KERNEL_OK")
</pallas_src>

<mosaic_0001>
module attributes {stable_mosaic.version = 11 : i64} {
  func.func @_loss_kernel(%arg0: i32, %arg1: i32, %arg2: memref<16x32xf32, #tpu.memory_space<vmem>>, %arg3: memref<1x16xf32, #tpu.memory_space<vmem>>, %arg4: memref<16x32xf32, #tpu.memory_space<vmem>>, %arg5: memref<16x16xf32, #tpu.memory_space<vmem>>, %arg6: memref<1x1x1xf32, #tpu.memory_space<vmem>>, %arg7: memref<16x1xf32, #tpu.memory_space<vmem>>) attributes {dimension_semantics = [#tpu.dimension_semantics<arbitrary>, #tpu.dimension_semantics<arbitrary>], iteration_bounds = array<i64: 1, 1>, scalar_prefetch = 0 : i64, scratch_operands = 1 : i64, tpu.core_type = #tpu.core_type<tc>, window_params = [{pipeline_mode = #tpu.pipeline_mode<synchronous>, transform_indices = @transform_0, window_bounds = array<i64: 16, 32>}, {pipeline_mode = #tpu.pipeline_mode<synchronous>, transform_indices = @transform_1, window_bounds = array<i64: 1, 16>}, {transform_indices = @transform_2, window_bounds = array<i64: 16, 32>}, {transform_indices = @transform_3, window_bounds = array<i64: 16, 16>}, {transform_indices = @transform_4, window_bounds = array<i64: 1, 1, 1>}]} {
    %c0 = arith.constant 0 : index
    %c0_0 = arith.constant 0 : index
    %0 = vector.load %arg2[%c0, %c0_0] : memref<16x32xf32, #tpu.memory_space<vmem>>, vector<16x32xf32>
    %c0_1 = arith.constant 0 : index
    %c0_2 = arith.constant 0 : index
    %1 = vector.load %arg3[%c0_1, %c0_2] : memref<1x16xf32, #tpu.memory_space<vmem>>, vector<1x16xf32>
    %c0_3 = arith.constant 0 : index
    %c0_4 = arith.constant 0 : index
    %2 = vector.load %arg4[%c0_3, %c0_4] : memref<16x32xf32, #tpu.memory_space<vmem>>, vector<16x32xf32>
    %c0_5 = arith.constant 0 : index
    %c0_6 = arith.constant 0 : index
    %3 = vector.load %arg5[%c0_5, %c0_6] : memref<16x16xf32, #tpu.memory_space<vmem>>, vector<16x16xf32>
    %cst = arith.constant dense<0.000000e+00> : vector<16x32xf32>
    %4 = tpu.matmul %3, %0, %cst {dimension_numbers = #tpu.dot_dimension_numbers<[1], [0], [0], [1], [0, 0, 1, 1], [], []>} : vector<16x16xf32>, vector<16x32xf32>, vector<16x32xf32> -> vector<16x32xf32>
    %5 = arith.subf %2, %4 : vector<16x32xf32>
    %6 = arith.mulf %5, %5 : vector<16x32xf32>
    %cst_7 = arith.constant dense<0.000000e+00> : vector<16xf32>
    %7 = vector.multi_reduction <add>, %6, %cst_7 [1] : vector<16x32xf32> to vector<16xf32>
    %8 = vector.shape_cast %7 : vector<16xf32> to vector<16x1xf32>
    %cst_8 = arith.constant 5.000000e-01 : f32
    %9 = vector.broadcast %cst_8 : f32 to vector<16x1xf32>
    %10 = arith.mulf %9, %8 : vector<16x1xf32>
    %11 = arith.mulf %2, %2 : vector<16x32xf32>
    %cst_9 = arith.constant dense<0.000000e+00> : vector<16xf32>
    %12 = vector.multi_reduction <add>, %11, %cst_9 [1] : vector<16x32xf32> to vector<16xf32>
    %13 = vector.shape_cast %12 : vector<16xf32> to vector<16x1xf32>
    %14 = arith.mulf %2, %4 : vector<16x32xf32>
    %cst_10 = arith.constant dense<0.000000e+00> : vector<16xf32>
    %15 = vector.multi_reduction <add>, %14, %cst_10 [1] : vector<16x32xf32> to vector<16xf32>
    %16 = vector.shape_cast %15 : vector<16xf32> to vector<16x1xf32>
    %cst_11 = arith.constant dense<0.000000e+00> : vector<16xf32>
    %17 = vector.multi_reduction <add>, %3, %cst_11 [1] : vector<16x16xf32> to vector<16xf32>
    %18 = vector.shape_cast %17 : vector<16xf32> to vector<16x1xf32>
    %19 = vector.broadcast %1 : vector<1x16xf32> to vector<16x16xf32>
    %20 = arith.mulf %3, %19 : vector<16x16xf32>
    %cst_12 = arith.constant dense<0.000000e+00> : vector<16xf32>
    %21 = vector.multi_reduction <add>, %20, %cst_12 [1] : vector<16x16xf32> to vector<16xf32>
    %22 = vector.shape_cast %21 : vector<16xf32> to vector<16x1xf32>
    %23 = arith.mulf %13, %18 : vector<16x1xf32>
    %24 = arith.addf %23, %22 : vector<16x1xf32>
    %cst_13 = arith.constant 2.000000e+00 : f32
    %25 = vector.broadcast %cst_13 : f32 to vector<16x1xf32>
    %26 = arith.mulf %25, %16 : vector<16x1xf32>
    %27 = arith.subf %24, %26 : vector<16x1xf32>
    %cst_14 = arith.constant 5.000000e-01 : f32
    %28 = vector.broadcast %cst_14 : f32 to vector<16x1xf32>
    %29 = arith.mulf %28, %27 : vector<16x1xf32>
    %30 = arith.addf %10, %29 : vector<16x1xf32>
    %c1_i32 = arith.constant 1 : i32
    %31 = arith.muli %arg0, %c1_i32 : i32
    %32 = arith.addi %31, %arg1 : i32
    %c16_i32 = arith.constant 16 : i32
    %33 = arith.muli %32, %c16_i32 : i32
    %34 = tpu.iota {dimensions = array<i32: 0>} : vector<16x1xi32>
    %35 = vector.broadcast %33 : i32 to vector<16x1xi32>
    %36 = arith.addi %35, %34 : vector<16x1xi32>
    %c16_i32_15 = arith.constant 16 : i32
    %37 = vector.broadcast %c16_i32_15 : i32 to vector<16x1xi32>
    %38 = arith.cmpi slt, %36, %37 : vector<16x1xi32>
    %cst_16 = arith.constant 0.000000e+00 : f32
    %39 = vector.broadcast %cst_16 : f32 to vector<16x1xf32>
    %40 = arith.select %38, %30, %39 : vector<16x1xi1>, vector<16x1xf32>
    %c0_i32 = arith.constant 0 : i32
    %41 = arith.cmpi eq, %arg1, %c0_i32 : i32
    %42 = arith.extui %41 : i1 to i32
    %c0_i32_17 = arith.constant 0 : i32
    %43 = arith.cmpi ne, %42, %c0_i32_17 : i32
    scf.if %43 {
      %c0_22 = arith.constant 0 : index
      %c0_23 = arith.constant 0 : index
      %50 = vector.load %arg7[%c0_22, %c0_23] : memref<16x1xf32, #tpu.memory_space<vmem>>, vector<16x1xf32>
      tpu.vector_store %arg7[%c0_22, %c0_23], %40 {strides = array<i32>} : memref<16x1xf32, #tpu.memory_space<vmem>>, vector<16x1xf32>,
    } else {
    }
    %c0_i32_18 = arith.constant 0 : i32
    %44 = arith.cmpi ne, %arg1, %c0_i32_18 : i32
    %45 = arith.extui %44 : i1 to i32
    %c0_i32_19 = arith.constant 0 : i32
    %46 = arith.cmpi ne, %45, %c0_i32_19 : i32
    scf.if %46 {
      %c0_22 = arith.constant 0 : index
      %c0_23 = arith.constant 0 : index
      %50 = vector.load %arg7[%c0_22, %c0_23] : memref<16x1xf32, #tpu.memory_space<vmem>>, vector<16x1xf32>
      %51 = arith.addf %50, %40 : vector<16x1xf32>
      %c0_24 = arith.constant 0 : index
      %c0_25 = arith.constant 0 : index
      %52 = vector.load %arg7[%c0_24, %c0_25] : memref<16x1xf32, #tpu.memory_space<vmem>>, vector<16x1xf32>
      tpu.vector_store %arg7[%c0_24, %c0_25], %51 {strides = array<i32>} : memref<16x1xf32, #tpu.memory_space<vmem>>, vector<16x1xf32>,
    } else {
    }
    %c0_i32_20 = arith.constant 0 : i32
    %47 = arith.cmpi eq, %arg1, %c0_i32_20 : i32
    %48 = arith.extui %47 : i1 to i32
    %c0_i32_21 = arith.constant 0 : i32
    %49 = arith.cmpi ne, %48, %c0_i32_21 : i32
    scf.if %49 {
      %c0_22 = arith.constant 0 : index
      %c0_23 = arith.constant 0 : index
      %50 = vector.load %arg7[%c0_22, %c0_23] : memref<16x1xf32, #tpu.memory_space<vmem>>, vector<16x1xf32>
      %51 = vector.shape_cast %50 : vector<16x1xf32> to vector<1x16x1xf32>
      %cst_24 = arith.constant dense<0.000000e+00> : vector<1xf32>
      %52 = vector.multi_reduction <add>, %51, %cst_24 [1, 2] : vector<1x16x1xf32> to vector<1xf32>
      %53 = vector.shape_cast %52 : vector<1xf32> to vector<1x1x1xf32>
      %54 = vector.extract %53[0, 0, 0] : f32 from vector<1x1x1xf32>
      %55 = vector.broadcast %54 : f32 to vector<1x1x1xf32>
      %c0_25 = arith.constant 0 : index
      %c0_26 = arith.constant 0 : index
      %c0_27 = arith.constant 0 : index
      %56 = vector.load %arg6[%c0_25, %c0_26, %c0_27] : memref<1x1x1xf32, #tpu.memory_space<vmem>>, vector<1x1x1xf32>
      tpu.vector_store %arg6[%c0_25, %c0_26, %c0_27], %55 {strides = array<i32>} : memref<1x1x1xf32, #tpu.memory_space<vmem>>, vector<1x1x1xf32>,
    } else {
    }
    return
  }
  func.func @transform_0(%arg0: i32, %arg1: i32) -> (i32, i32) {
    %c0_i32 = arith.constant 0 : i32
    %c0_i32_0 = arith.constant 0 : i32
    %c0_i32_1 = arith.constant 0 : i32
    return %c0_i32, %c0_i32_0 : i32, i32
  }
  func.func @transform_1(%arg0: i32, %arg1: i32) -> (i32, i32) {
    %c0_i32 = arith.constant 0 : i32
    %c0_i32_0 = arith.constant 0 : i32
    %c0_i32_1 = arith.constant 0 : i32
    return %c0_i32, %c0_i32_0 : i32, i32
  }
  func.func @transform_2(%arg0: i32, %arg1: i32) -> (i32, i32) {
    %c1_i32 = arith.constant 1 : i32
    %0 = arith.muli %arg0, %c1_i32 : i32
    %1 = arith.addi %0, %arg1 : i32
    %c0_i32 = arith.constant 0 : i32
    %2 = arith.minsi %1, %c0_i32 : i32
    %c0_i32_0 = arith.constant 0 : i32
    %c0_i32_1 = arith.constant 0 : i32
    return %2, %c0_i32_0 : i32, i32
  }
  func.func @transform_3(%arg0: i32, %arg1: i32) -> (i32, i32) {
    %c1_i32 = arith.constant 1 : i32
    %0 = arith.muli %arg0, %c1_i32 : i32
    %1 = arith.addi %0, %arg1 : i32
    %c0_i32 = arith.constant 0 : i32
    %2 = arith.minsi %1, %c0_i32 : i32
    %c0_i32_0 = arith.constant 0 : i32
    %c0_i32_1 = arith.constant 0 : i32
    return %2, %c0_i32_0 : i32, i32
  }
  func.func @transform_4(%arg0: i32, %arg1: i32) -> (i32, i32, i32) {
    %c0_i32 = arith.constant 0 : i32
    %c0_i32_0 = arith.constant 0 : i32
    %c0_i32_1 = arith.constant 0 : i32
    return %arg0, %c0_i32, %c0_i32_0 : i32, i32, i32
  }
}

</mosaic_0001>

<bundles_post_ra>
// kernel: tpu_custom_call.1
= control target key start
LH: loop header
LB: loop body
LE: loop exit
PB: predicated region body
PF: predicated region fallthrough
CT: control target
= control target key end

     0   :  { %9 = vsyncpa [#allocation4], 0  ;;  %s469_s0 = inlined_call_operand.hbm [shape: f32[16,32], index: 0, kind: input, shape index: {}]   ;;  %s470_s1 = inlined_call_operand.hbm [shape: f32[1,16], index: 1, kind: input, shape index: {}]   ;;  %s471_s2 = inlined_call_operand.hbm [shape: f32[16,32], index: 2, kind: input, shape index: {}]   ;;  %s472_s3 = inlined_call_operand.hbm [shape: f32[16,16], index: 3, kind: input, shape index: {}]   ;;  %s473_s4 = inlined_call_operand.hbm [shape: f32[1,1,1], index: 4, kind: output, shape index: {}]  }
   0x1   :  { %10 = vsyncpa [#allocation7], 0 }
   0x2   :  { %11 = vsyncpa [#allocation10], 0  ;;  %s31_s17 = sshll.u32 %s470_s1, 4  ;;  %s32_s17 = int_to_ptr.hbm [resolvable:$true] %s31_s17 }
   0x3   :  { %12 = vsyncpa [#allocation5], 0  ;;  %s410_s18 = smov [#allocation6]   ;;  %s17_s22 = sshll.u32 %s469_s0, 4  ;;  %s18_s22 = int_to_ptr.hbm [resolvable:$true] %s17_s22 }
   0x4   :  { %s33_s19 = sshll.u32 %s410_s18, 4  ;;  %s411_s23 = smov [#allocation3]   ;;  %s34_s19 = int_to_ptr.vmem [resolvable:$true] %s33_s19 }
   0x5   :  { %36 = dma.hbm_to_vmem [thread:$0]  %s32_s17, 16, %s34_s19, [#allocation7]  }
   0x6   :  { %s19_s24 = sshll.u32 %s411_s23, 4  ;;  %s412_s25 = smov 128   ;;  %s20_s24 = int_to_ptr.vmem [resolvable:$true] %s19_s24 }
   0x7   :  { %s413_s26 = smov 8   ;;  %s47_s1 = sshll.u32 %s471_s2, 4  ;;  %s48_s1 = int_to_ptr.hbm [resolvable:$true] %s47_s1 }
   0x8   :  { %25 = dma.hbm_to_vmem [thread:$0]  %s18_s22, 256, %s20_s24, [#allocation4], %s412_s25, %s412_s25, %s413_s26  }
   0x9   :  { %s414_s29 = smov [#allocation8]   ;;  %s66_s0 = sshll.u32 %s472_s3, 4  ;;  %s67_s0 = int_to_ptr.hbm [resolvable:$true] %s66_s0 }
   0xa   :  { %s49_s30 = sshll.u32 %s414_s29, 4  ;;  %s415_s7 = smov [#allocation9]   ;;  %s50_s30 = int_to_ptr.vmem [resolvable:$true] %s49_s30 }
   0xb   :  { %55 = dma.hbm_to_vmem [thread:$0]  %s48_s1, 256, %s50_s30, [#allocation7], %s412_s25, %s412_s25, %s413_s26  }
   0xc   :  { %s68_s8 = sshll.u32 %s415_s7, 4  ;;  %s69_s8 = int_to_ptr.vmem [resolvable:$true] %s68_s8 }
   0xd   :  { %74 = dma.hbm_to_vmem [thread:$0]  %s67_s0, 256, %s69_s8, [#allocation10], %s412_s25, %s412_s25, %s413_s26  }
   0xe   :  { %402 = dma.done.wait [#allocation4], 256  }
   0xf   :  { %403 = vsyncadd [#allocation4], 4294967040 }
  0x10   :  { %404 = dma.done.wait [#allocation7], 272  }
  0x11   :  { %405 = vsyncadd [#allocation7], 4294967024 }
  0x12   :  { %406 = dma.done.wait [#allocation10], 256  }
  0x13   :  { %407 = vsyncadd [#allocation10], 4294967040  ;;  %v100_v0 = vld [vmem:[#allocation3 + $0x8] sm:$0xff]  ;;  %v99_v1 = vld [vmem:[#allocation3] sm:$0xff]  ;;  %vm106_vm0 = vcmask 130048   ;;  %vm140_vm1 = vcmask 261120  }
  0x14   :  { %v104_v2 = vld [vmem:[#allocation9] sm:$0xff]  ;;  %127 = vmatpush.msra.mxu0 %v100_v0  ;;  %270 = vmatpush.msra.mxu1 %v100_v0  ;;  %v105_v3 = vld [vmem:[#allocation9 + $0x8] sm:$0xff]  ;;  %v102_v4 = vld [vmem:[#allocation8] sm:$0xff]  ;;  %vm210_vm2 = vcmask 7168   ;;  %s416_s2 = smov [#allocation11]   ;;  %s252_s11 = sshll.u32 %s473_s4, 4  ;;  %s253_s11 = int_to_ptr.hbm [resolvable:$true] %s252_s11 }
  0x15   :  { %v165_v5 = vsel %vm106_vm0, %v104_v2, 0.0  ;;  %v149_v6 = vmul.f32 %v102_v4, %v102_v4  ;;  %v103_v7 = vld [vmem:[#allocation8 + $0x8] sm:$0xff]  ;;  %v168_v10 = vsel %vm106_vm0, %v105_v3, 0.0  ;;  %v281_v12 = vld [vmem:[#allocation6] ss:$0 sm:$0xff]  ;;  %s250_s3 = sshll.u32 %s416_s2, 4  ;;  %s251_s3 = int_to_ptr.vmem [resolvable:$true] %s250_s3 }
  0x16   :  { %166 = vadd.xlane.f32.xlu1 %v165_v5  ;;  %128 = vmatpush.msra.mxu0 %v99_v1  ;;  %v150_v9 = vmul.f32 %v103_v7, %v103_v7  ;;  %v174_v13 = vmul.f32 %v281_v12, %v104_v2  ;;  %v175_v15 = vmul.f32 %v281_v12, %v105_v3  ;;  %vm243_vm3 = vcmask 0  }
  0x17   :  { %271 = vmatpush.msra.mxu1 %v99_v1  ;;  %268 = vmatmul.msk.f32.vlgmr.msra.gmra.mxu0 %vm106_vm0, %v104_v2  ;;  %v151_v8 = vsel %vm140_vm1, %v149_v6, 0.0 }
  0x18   :  { %269 = vmatmul.msk.f32.vlgmr.msra.gmra.mxu1 %vm106_vm0, %v105_v3  ;;  %152 = vadd.xlane.f32.xlu0 %v151_v8  ;;  %v154_v11 = vsel %vm140_vm1, %v150_v9, 0.0  ;;  %v176_v14 = vsel %vm106_vm0, %v174_v13, 0.0  ;;  %v179_v16 = vsel %vm106_vm0, %v175_v15, 0.0 }
  0x1e   :  { %169 = vadd.xlane.f32.xlu1 %v168_v10 }
  0x20   :  { %155 = vadd.xlane.f32.xlu0 %v154_v11 }
  0x26   :  { %180 = vadd.xlane.f32.xlu1 %v179_v16 }
  0x28   :  { %177 = vadd.xlane.f32.xlu0 %v176_v14 }
  0x89   :  { %v167_v30 = vpop.xlane.xlu1 %166 }
  0x8b   :  { %v153_v29 = vpop.xlane.xlu0 %152 }
  0x8c   :  { %v182_v37 = vmul.f32 %v167_v30, %v153_v29 }
  0x91   :  { %v170_v32 = vpop.xlane.xlu1 %169 }
  0x93   :  { %v156_v31 = vpop.xlane.xlu0 %155 }
  0x94   :  { %v130_v17 = vpop.f32.mrf.mxu0  ;;  %v183_v35 = vmul.f32 %v170_v32, %v156_v31 }
  0x95   :  { %v133_v18 = vpop.f32.mrf.mxu1  ;;  %v157_v19 = vmul.f32 %v130_v17, %v102_v4  ;;  %v136_v26 = vsub.f32 %v102_v4, %v130_v17 }
  0x96   :  { %v137_v20 = vsub.f32 %v103_v7, %v133_v18  ;;  %v158_v23 = vmul.f32 %v133_v18, %v103_v7 }
  0x97   :  { %v159_v21 = vsel %vm140_vm1, %v157_v19, 0.0  ;;  %v138_v27 = vmul.f32 %v136_v26, %v136_v26 }
  0x98   :  { %v139_v22 = vmul.f32 %v137_v20, %v137_v20  ;;  %160 = vadd.xlane.f32.xlu2 %v159_v21  ;;  %v162_v25 = vsel %vm140_vm1, %v158_v23, 0.0 }
  0x99   :  { %v141_v28 = vsel %vm140_vm1, %v138_v27, 0.0  ;;  %v181_v36 = vpop.xlane.xlu1 %180 }
  0x9a   :  { %v144_v24 = vsel %vm140_vm1, %v139_v22, 0.0  ;;  %v185_v40 = vadd.f32 %v183_v35, %v181_v36 }
  0x9b   :  { %145 = vadd.xlane.f32.xlu0 %v144_v24  ;;  %v178_v34 = vpop.xlane.xlu0 %177 }
  0x9c   :  { %v184_v43 = vadd.f32 %v182_v37, %v178_v34 }
  0xa0   :  { %163 = vadd.xlane.f32.xlu2 %v162_v25 }
  0xa8   :  { %142 = vadd.xlane.f32.xlu2 %v141_v28 }
 0x10b   :  { %v161_v33 = vpop.xlane.xlu2 %160 }
 0x10c   :  { %v186_v39 = vmul.f32 2.0, %v161_v33 }
 0x10e   :  { %v146_v42 = vpop.xlane.xlu0 %145  ;;  %v188_v45 = vsub.f32 %v184_v43, %v186_v39 }
 0x10f   :  { %v148_v47 = vmul.f32 0.5, %v146_v42 }
 0x110   :  { %v190_v50 = vmul.f32 0.5, %v188_v45 }
 0x113   :  { %v164_v38 = vpop.xlane.xlu2 %163 }
 0x114   :  { %v187_v41 = vmul.f32 2.0, %v164_v38 }
 0x116   :  { %v189_v44 = vsub.f32 %v185_v40, %v187_v41 }
 0x118   :  { %v191_v46 = vmul.f32 0.5, %v189_v44 }
 0x11a   :  { %v193_v48 = vadd.f32 %v191_v46, %v148_v47 }
 0x11b   :  { %v143_v49 = vpop.xlane.xlu2 %142 }
 0x11c   :  { %212 = vst.msk [vmem:[#allocation2 + $0x8] sm:$0xff] %vm210_vm2, %v193_v48  ;;  %v147_v51 = vmul.f32 0.5, %v143_v49 }
 0x11e   :  { %v192_v52 = vadd.f32 %v190_v50, %v147_v51 }
 0x120   :  { %211 = vst.msk [vmem:[#allocation2] sm:$0xff] %vm210_vm2, %v192_v52 }
 0x123   :  { %v228_v53 = vld [vmem:[#allocation2 + $0x8] sm:$0xff] }
 0x124   :  { %v231_v56 = vsel %vm210_vm2, %v228_v53, 0.0 }
 0x127   :  { %v227_v54 = vld [vmem:[#allocation2] sm:$0xff] }
 0x128   :  { %v230_v55 = vsel %vm210_vm2, %v227_v54, 0.0 }
 0x129   :  { %v232_v57 = vadd.f32 %v231_v56, %v230_v55 }
 0x12b   :  { %233 = vadd.xlane.f32.xlu1 %v232_v57 }
 0x19e   :  { %v234_v58 = vpop.xlane.xlu1 %233 }
 0x19f   :  { %v235_v59 = vrot.slane %v234_v58, 4 }
 0x1a1   :  { %v236_v60 = vadd.f32 %v235_v59, %v234_v58 }
 0x1a3   :  { %v237_v61 = vrot.slane %v236_v60, 2 }
 0x1a5   :  { %v238_v62 = vadd.f32 %v237_v61, %v236_v60 }
 0x1a7   :  { %v239_v63 = vrot.slane %v238_v62, 1 }
 0x1a9   :  { %v240_v0 = vadd.f32 %v239_v63, %v238_v62 }
 0x1ab   :  { %272 = vpush %v240_v0 }
 0x1dc   :  { %s273_s12 = spop %272 }
 0x1dd   :  { %v242_v1 = vstv %s273_s12 }
 0x1de   :  { %244 = vst.msk [vmem:[#allocation11] sm:$0x1] %vm243_vm3, %v242_v1 }
 0x1df   :  { %255 = dma.vmem_to_hbm [thread:$0]  %s251_s3, 16, %s253_s11, [#allocation5]  }
 0x1e0   :  { %408 = dma.done.wait [#allocation5], 16  }
 0x1e1   :  { %409 = vsyncadd [#allocation5], 4294967280 }
 0x1e2   :  { %260 = vsyncpa [#allocation4], 1 }
 0x1e3   :  { %261 = vsyncpa [#allocation7], 1 }
 0x1e4   :  { %262 = vsyncpa [#allocation10], 1 }
 0x1e5   :  { %263 = vsyncpa [#allocation5], 1 }

</bundles_post_ra>
